<compile_context>
chip_gen: v6e
topology: v6e:2x2x1
jax: 0.10.0
libtpu: 0.0.40
codegen_flags: <defaults>
</compile_context>

<pallas_src>
import jax
import jax.numpy as jnp
from jax.experimental import pallas as pl
from jax.experimental.pallas import tpu as pltpu


# --------------------------------------------------------------------------- #
# helpers
# --------------------------------------------------------------------------- #
def _round_up(x: int, m: int) -> int:
    return (x + m - 1) // m * m


def _vmem_capacity_bytes(default=64 * 1024 * 1024) -> int:
    """Physical VMEM of the local chip; conservative 64 MiB if unqueryable."""
    try:
        info = pltpu.get_tpu_info()
        cap = getattr(info, "vmem_capacity_bytes", None)
        return int(cap) if cap else default
    except Exception:
        return default


def _auto_tile_m(m_rows, dims, c, h, x_itemsize, w_itemsize, budget_bytes):
    """Largest row tile (multiple of 8) that fits the VMEM budget, while still
    leaving >=4 grid steps (so v7x's 2 TensorCores both get work)."""
    cin = sum(dims)
    # grid-resident weights; count double-buffered allocation to be safe
    weight_bytes = 2 * (cin * c + c + 2 * c * h) * w_itemsize
    steps_cap = max(8, _round_up(-(-m_rows // 4), 8))      # <= ~M/4 rows per step
    tile = min(_round_up(max(m_rows, 1), 8), 4096, steps_cap)

    def fits(t):
        per_step = (2 * t * cin * x_itemsize          # input tiles, double-buffered
                    + 2 * t * c * x_itemsize          # output tile, double-buffered
                    + t * (3 * c + h) * 4)            # f32 intermediates e, g, h
        return weight_bytes + per_step <= budget_bytes

    while tile > 8 and not fits(tile):
        tile = max(8, (tile // 2) // 8 * 8)
    return tile


# --------------------------------------------------------------------------- #
# kernel
# --------------------------------------------------------------------------- #
def _make_kernel(n_inputs):
    def kernel(*refs):
        # refs = x_0..x_{n-1}, wf_0..wf_{n-1}, bf, w1_t, w2_t, out
        x_refs = refs[:n_inputs]
        wf_refs = refs[n_inputs:2 * n_inputs]
        bf_ref, w1_ref, w2_ref, o_ref = refs[2 * n_inputs:]

        # fused concat + fusion Linear: e = sum_i x_i @ Wf_i^T + bf  (f32 MXU acc)
        acc = jnp.dot(x_refs[0][...], wf_refs[0][...],
                      preferred_element_type=jnp.float32)
        for xr, wr in zip(x_refs[1:], wf_refs[1:]):
            acc = acc + jnp.dot(xr[...], wr[...],
                                preferred_element_type=jnp.float32)
        e = acc + bf_ref[...].astype(jnp.float32)

        # SE squeeze + ReLU (tiny H, kept unpadded)
        h = jnp.dot(e, w1_ref[...], preferred_element_type=jnp.float32)
        h = jnp.maximum(h, 0.0)

        # SE excitation + sigmoid (EUP)
        g = jnp.dot(h, w2_ref[...], preferred_element_type=jnp.float32)
        g = jax.nn.sigmoid(g)

        # channel gating
        o_ref[...] = (e * g).astype(o_ref.dtype)

    return kernel


# --------------------------------------------------------------------------- #
# wrapper
# --------------------------------------------------------------------------- #
def concat_dense_se_pallas(inputs, wf, bf, w1, w2, *, tile_m=None):
    """Forward pass of ConcatDenseSE (inference / eval mode).

    inputs: sequence of (M, D_i) arrays (concat is fused into the kernel),
            or a single (M, Cin) array.
    wf: (C, Cin)  fusion Linear weight (PyTorch layout: out x in)
    bf: (C,)      fusion Linear bias
    w1: (H, C)    SE squeeze weight (no bias), H = C // se_ratio
    w2: (C, H)    SE excitation weight (no bias)
    Returns: (M, C)
    """
    if not isinstance(inputs, (list, tuple)):
        inputs = (inputs,)
    inputs = tuple(inputs)
    # TODO(synk): fusion_dropout is identity here (eval mode); training-mode
    # dropout (pltpu.prng_* masking) is not implemented.

    M = int(inputs[0].shape[0])
    dims = tuple(int(x.shape[1]) for x in inputs)
    Cin = sum(dims)
    C, Cin_w = wf.shape
    H = w1.shape[0]
    assert Cin_w == Cin, (Cin_w, Cin)
    assert w1.shape == (H, C) and w2.shape == (C, H) and bf.shape == (C,)
    assert all(int(x.shape[0]) == M for x in inputs)

    out_dtype = inputs[0].dtype
    x_itemsize = jnp.dtype(out_dtype).itemsize
    w_itemsize = jnp.dtype(wf.dtype).itemsize

    # Pre-transpose the weights once in plain JAX (no in-kernel .T) and split
    # the fusion weight per modality so the concat never materializes.
    wf_t = wf.T                                   # (Cin, C)
    wf_parts, off = [], 0
    for d in dims:
        wf_parts.append(wf_t[off:off + d, :])     # (D_i, C)
        off += d
    bf2 = bf.reshape(1, C)
    w1_t = w1.T                                   # (C, H)
    w2_t = w2.T                                   # (H, C)

    # Generation-aware VMEM budget (v5e/v6e: 128 MiB -> ~96 MiB; v7x: 64 -> ~48).
    vmem_cap = _vmem_capacity_bytes()
    budget_bytes = int(vmem_cap * 0.70)
    vmem_limit_bytes = int(vmem_cap * 0.75)

    if tile_m is None:
        tile_m = _auto_tile_m(M, dims, C, H, x_itemsize, w_itemsize, budget_bytes)
    tile_m = max(8, _round_up(int(tile_m), 8))

    grid = (pl.cdiv(M, tile_m),)                  # ragged last block is masked

    in_specs = (
        [pl.BlockSpec((tile_m, d), lambda i: (i, 0)) for d in dims]     # x_i tiles
        + [pl.BlockSpec((d, C), lambda i: (0, 0)) for d in dims]        # Wf_i^T
        + [pl.BlockSpec((1, C), lambda i: (0, 0)),                      # bias
           pl.BlockSpec((C, H), lambda i: (0, 0)),                      # W1^T
           pl.BlockSpec((H, C), lambda i: (0, 0))]                      # W2^T
    )
    out_spec = pl.BlockSpec((tile_m, C), lambda i: (i, 0))

    cost = pl.CostEstimate(
        flops=int(2 * M * Cin * C + 4 * M * C * H + 4 * M * C),
        transcendentals=int(M * C),
        bytes_accessed=int((M * Cin + M * C) * x_itemsize
                           + (Cin * C + C + 2 * C * H) * w_itemsize),
    )

    out = pl.pallas_call(
        _make_kernel(len(inputs)),
        out_shape=jax.ShapeDtypeStruct((M, C), out_dtype),
        grid_spec=pltpu.PrefetchScalarGridSpec(
            num_scalar_prefetch=0,
            grid=grid,
            in_specs=in_specs,
            out_specs=out_spec,
        ),
        compiler_params=pltpu.CompilerParams(
            dimension_semantics=("parallel",),
            vmem_limit_bytes=vmem_limit_bytes,
        ),
        cost_estimate=cost,
    )(*inputs, *wf_parts, bf2, w1_t, w2_t)
    return out


# --------------------------------------------------------------------------- #
# pure-JAX reference (matches the PyTorch forward in eval mode)
# --------------------------------------------------------------------------- #
def concat_dense_se_reference(inputs, wf, bf, w1, w2):
    x = jnp.concatenate(inputs, axis=1) if isinstance(inputs, (list, tuple)) else inputs
    e = x @ wf.T + bf
    h = jnp.maximum(e @ w1.T, 0.0)
    g = jax.nn.sigmoid(h @ w2.T)
    return e * g


if __name__ == "__main__":
    # Two modality embeddings -> concat -> fusion Linear(64 -> 32) -> SENet(32, ratio=8)
    batch = 50                           # deliberately ragged (exercises boundary masking)
    dims = (40, 24)                      # multimodal_hidden_size = 64
    hidden_size = 32
    se_ratio = 8
    se_hidden = hidden_size // se_ratio  # 4

    key = jax.random.PRNGKey(0)
    k_a, k_b, k_wf, k_bf, k_w1, k_w2 = jax.random.split(key, 6)

    inputs = [
        jax.random.normal(k_a, (batch, dims[0]), dtype=jnp.float32),
        jax.random.normal(k_b, (batch, dims[1]), dtype=jnp.float32),
    ]
    wf = jax.random.normal(k_wf, (hidden_size, sum(dims)), dtype=jnp.float32) * 0.05
    bf = jax.random.normal(k_bf, (hidden_size,), dtype=jnp.float32) * 0.05
    w1 = jax.random.normal(k_w1, (se_hidden, hidden_size), dtype=jnp.float32) * 0.1
    w2 = jax.random.normal(k_w2, (hidden_size, se_hidden), dtype=jnp.float32) * 0.1

    ref = concat_dense_se_reference(inputs, wf, bf, w1, w2)

    # Auto tile selection (>=4 grid steps, ragged last block).
    out = jax.block_until_ready(concat_dense_se_pallas(inputs, wf, bf, w1, w2))
    assert out.shape == ref.shape
    assert jnp.allclose(out, ref, atol=2e-4, rtol=2e-4), "mismatch (auto tile)"

    # Explicit small row tile -> more pipelined grid steps.
    out2 = jax.block_until_ready(
        concat_dense_se_pallas(inputs, wf, bf, w1, w2, tile_m=8))
    assert jnp.allclose(out2, ref, atol=2e-4, rtol=2e-4), "mismatch (tile_m=8)"

    # Single pre-concatenated input path still works.
    x_cat = jnp.concatenate(inputs, axis=1)
    out3 = jax.block_until_ready(concat_dense_se_pallas(x_cat, wf, bf, w1, w2))
    assert jnp.allclose(out3, ref, atol=2e-4, rtol=2e-4), "mismatch (pre-concat)"

    print("KERNEL_OK")
</pallas_src>

<mosaic_0001>
module attributes {stable_mosaic.version = 11 : i64} {
  func.func @kernel(%arg0: i32, %arg1: memref<16x40xf32, #tpu.memory_space<vmem>>, %arg2: memref<16x24xf32, #tpu.memory_space<vmem>>, %arg3: memref<40x32xf32, #tpu.memory_space<vmem>>, %arg4: memref<24x32xf32, #tpu.memory_space<vmem>>, %arg5: memref<1x32xf32, #tpu.memory_space<vmem>>, %arg6: memref<32x4xf32, #tpu.memory_space<vmem>>, %arg7: memref<4x32xf32, #tpu.memory_space<vmem>>, %arg8: memref<16x32xf32, #tpu.memory_space<vmem>>) attributes {dimension_semantics = [#tpu.dimension_semantics<parallel>], iteration_bounds = array<i64: 4>, scalar_prefetch = 0 : i64, scratch_operands = 0 : i64, tpu.core_type = #tpu.core_type<tc>, window_params = [{transform_indices = @transform_0, window_bounds = array<i64: 16, 40>}, {transform_indices = @transform_1, window_bounds = array<i64: 16, 24>}, {pipeline_mode = #tpu.pipeline_mode<synchronous>, transform_indices = @transform_2, window_bounds = array<i64: 40, 32>}, {pipeline_mode = #tpu.pipeline_mode<synchronous>, transform_indices = @transform_3, window_bounds = array<i64: 24, 32>}, {pipeline_mode = #tpu.pipeline_mode<synchronous>, transform_indices = @transform_4, window_bounds = array<i64: 1, 32>}, {pipeline_mode = #tpu.pipeline_mode<synchronous>, transform_indices = @transform_5, window_bounds = array<i64: 32, 4>}, {pipeline_mode = #tpu.pipeline_mode<synchronous>, transform_indices = @transform_6, window_bounds = array<i64: 4, 32>}, {transform_indices = @transform_7, window_bounds = array<i64: 16, 32>}]} {
    %c0 = arith.constant 0 : index
    %c0_0 = arith.constant 0 : index
    %0 = vector.load %arg1[%c0, %c0_0] : memref<16x40xf32, #tpu.memory_space<vmem>>, vector<16x40xf32>
    %c0_1 = arith.constant 0 : index
    %c0_2 = arith.constant 0 : index
    %1 = vector.load %arg3[%c0_1, %c0_2] : memref<40x32xf32, #tpu.memory_space<vmem>>, vector<40x32xf32>
    %cst = arith.constant dense<0.000000e+00> : vector<16x32xf32>
    %2 = tpu.matmul %0, %1, %cst {dimension_numbers = #tpu.dot_dimension_numbers<[1], [0], [0], [1], [0, 0, 1, 1], [], []>} : vector<16x40xf32>, vector<40x32xf32>, vector<16x32xf32> -> vector<16x32xf32>
    %c0_3 = arith.constant 0 : index
    %c0_4 = arith.constant 0 : index
    %3 = vector.load %arg2[%c0_3, %c0_4] : memref<16x24xf32, #tpu.memory_space<vmem>>, vector<16x24xf32>
    %c0_5 = arith.constant 0 : index
    %c0_6 = arith.constant 0 : index
    %4 = vector.load %arg4[%c0_5, %c0_6] : memref<24x32xf32, #tpu.memory_space<vmem>>, vector<24x32xf32>
    %cst_7 = arith.constant dense<0.000000e+00> : vector<16x32xf32>
    %5 = tpu.matmul %3, %4, %cst_7 {dimension_numbers = #tpu.dot_dimension_numbers<[1], [0], [0], [1], [0, 0, 1, 1], [], []>} : vector<16x24xf32>, vector<24x32xf32>, vector<16x32xf32> -> vector<16x32xf32>
    %6 = arith.addf %2, %5 : vector<16x32xf32>
    %c0_8 = arith.constant 0 : index
    %c0_9 = arith.constant 0 : index
    %7 = vector.load %arg5[%c0_8, %c0_9] : memref<1x32xf32, #tpu.memory_space<vmem>>, vector<1x32xf32>
    %8 = vector.broadcast %7 : vector<1x32xf32> to vector<16x32xf32>
    %9 = arith.addf %6, %8 : vector<16x32xf32>
    %c0_10 = arith.constant 0 : index
    %c0_11 = arith.constant 0 : index
    %10 = vector.load %arg6[%c0_10, %c0_11] : memref<32x4xf32, #tpu.memory_space<vmem>>, vector<32x4xf32>
    %cst_12 = arith.constant dense<0.000000e+00> : vector<16x4xf32>
    %11 = tpu.matmul %9, %10, %cst_12 {dimension_numbers = #tpu.dot_dimension_numbers<[1], [0], [0], [1], [0, 0, 1, 1], [], []>} : vector<16x32xf32>, vector<32x4xf32>, vector<16x4xf32> -> vector<16x4xf32>
    %cst_13 = arith.constant 0.000000e+00 : f32
    %12 = vector.broadcast %cst_13 : f32 to vector<16x4xf32>
    %13 = arith.maximumf %11, %12 : vector<16x4xf32>
    %c0_14 = arith.constant 0 : index
    %c0_15 = arith.constant 0 : index
    %14 = vector.load %arg7[%c0_14, %c0_15] : memref<4x32xf32, #tpu.memory_space<vmem>>, vector<4x32xf32>
    %cst_16 = arith.constant dense<0.000000e+00> : vector<16x32xf32>
    %15 = tpu.matmul %13, %14, %cst_16 {dimension_numbers = #tpu.dot_dimension_numbers<[1], [0], [0], [1], [0, 0, 1, 1], [], []>} : vector<16x4xf32>, vector<4x32xf32>, vector<16x32xf32> -> vector<16x32xf32>
    %16 = arith.negf %15 : vector<16x32xf32>
    %17 = math.exp %16 : vector<16x32xf32>
    %cst_17 = arith.constant 1.000000e+00 : f32
    %18 = vector.broadcast %cst_17 : f32 to vector<16x32xf32>
    %19 = arith.addf %18, %17 : vector<16x32xf32>
    %20 = arith.divf %18, %19 : vector<16x32xf32>
    %21 = arith.mulf %9, %20 : vector<16x32xf32>
    %c0_18 = arith.constant 0 : index
    %c0_19 = arith.constant 0 : index
    %22 = vector.load %arg8[%c0_18, %c0_19] : memref<16x32xf32, #tpu.memory_space<vmem>>, vector<16x32xf32>
    tpu.vector_store %arg8[%c0_18, %c0_19], %21 {strides = array<i32>} : memref<16x32xf32, #tpu.memory_space<vmem>>, vector<16x32xf32>,
    return
  }
  func.func @transform_0(%arg0: i32) -> (i32, i32) {
    %c0_i32 = arith.constant 0 : i32
    %c0_i32_0 = arith.constant 0 : i32
    return %arg0, %c0_i32 : i32, i32
  }
  func.func @transform_1(%arg0: i32) -> (i32, i32) {
    %c0_i32 = arith.constant 0 : i32
    %c0_i32_0 = arith.constant 0 : i32
    return %arg0, %c0_i32 : i32, i32
  }
  func.func @transform_2(%arg0: i32) -> (i32, i32) {
    %c0_i32 = arith.constant 0 : i32
    %c0_i32_0 = arith.constant 0 : i32
    %c0_i32_1 = arith.constant 0 : i32
    return %c0_i32, %c0_i32_0 : i32, i32
  }
  func.func @transform_3(%arg0: i32) -> (i32, i32) {
    %c0_i32 = arith.constant 0 : i32
    %c0_i32_0 = arith.constant 0 : i32
    %c0_i32_1 = arith.constant 0 : i32
    return %c0_i32, %c0_i32_0 : i32, i32
  }
  func.func @transform_4(%arg0: i32) -> (i32, i32) {
    %c0_i32 = arith.constant 0 : i32
    %c0_i32_0 = arith.constant 0 : i32
    %c0_i32_1 = arith.constant 0 : i32
    return %c0_i32, %c0_i32_0 : i32, i32
  }
  func.func @transform_5(%arg0: i32) -> (i32, i32) {
    %c0_i32 = arith.constant 0 : i32
    %c0_i32_0 = arith.constant 0 : i32
    %c0_i32_1 = arith.constant 0 : i32
    return %c0_i32, %c0_i32_0 : i32, i32
  }
  func.func @transform_6(%arg0: i32) -> (i32, i32) {
    %c0_i32 = arith.constant 0 : i32
    %c0_i32_0 = arith.constant 0 : i32
    %c0_i32_1 = arith.constant 0 : i32
    return %c0_i32, %c0_i32_0 : i32, i32
  }
  func.func @transform_7(%arg0: i32) -> (i32, i32) {
    %c0_i32 = arith.constant 0 : i32
    %c0_i32_0 = arith.constant 0 : i32
    return %arg0, %c0_i32 : i32, i32
  }
}

</mosaic_0001>

<bundles_post_ra>
// kernel: tpu_custom_call.1
= control target key start
LH: loop header
LB: loop body
LE: loop exit
PB: predicated region body
PF: predicated region fallthrough
CT: control target
= control target key end

     0   :  { %s1274_s24 = smov 0   ;;  %s1276_s25 = smov 0   ;;  %s1406_s0 = inlined_call_operand.vmem [shape: f32[50,40], index: 0, kind: input, shape index: {}]   ;;  %s1407_s1 = inlined_call_operand.vmem [shape: f32[50,24], index: 1, kind: input, shape index: {}]   ;;  %s1408_s2 = inlined_call_operand.vmem [shape: f32[40,32], index: 2, kind: input, shape index: {}]   ;;  %s1409_s3 = inlined_call_operand.vmem [shape: f32[24,32], index: 3, kind: input, shape index: {}]   ;;  %s1410_s4 = inlined_call_operand.vmem [shape: f32[1,32], index: 4, kind: input, shape index: {}]   ;;  %s1411_s5 = inlined_call_operand.vmem [shape: f32[32,4], index: 5, kind: input, shape index: {}]   ;;  %s1412_s6 = inlined_call_operand.vmem [shape: f32[4,32], index: 6, kind: input, shape index: {}]   ;;  %s1413_s7 = inlined_call_operand.vmem [shape: f32[50,32], index: 7, kind: output, shape index: {}]  }
   0x1   :  { %s1278_s26 = smov 0  }
   0x2 LB: > { %s1287_s27 = sadd.s32 4294967295, %s1200_s26   ;;  %s1289_s28 = sadd.s32 1, %s1200_s26   ;;  %s1200_s26 = sphi %s1278_s26, %s1417_s26   ;;  %s1196_s25 = sphi %s1276_s25, %s1416_s25   ;;  %s1192_s24 = sphi %s1274_s24, %s1415_s24  }
   0x3   : > { %s178_s29 = ssub.s32 %s1200_s26, %s1289_s28  ;;  %s181_s30 = sadd.s32 1, %s1196_s25 }
   0x4   : > { %p179_p0 = scmp.eq.s32.totalorder %s178_s29, 0  ;;  %p191_p1 = scmp.ne.s32.totalorder %s1196_s25, %s1192_s24 }
   0x5   : > { %p192_p2 = scmp.eq.s32.totalorder %s1287_s27, 3  ;;  %p953_p3 = scmp.ge.s32.totalorder %s1200_s26, 1 }
   0x6   : > { %s1297_s8 = scalar_select %p179_p0, %s1196_s25, %s181_s30  }
   0x7   : > { %p1299_p4 = por %p192_p2, %p191_p1  ;;  %p265_p5 = scmp.lt.s32.totalorder %s1200_s26, 5 }
   0x9   : > { %p266_p6 = pnand %p953_p3, %p265_p5 }
   0xa   : > { %s1313_s16 = sshll.u32 (!%p266_p6), %s1287_s27, 1  ;;  %s306_s14 = sand.u32 (!%p266_p6), 1, %s1192_s24  }
   0xb   : > { %269 = sbr.rel (%p266_p6) target bundleno = 694 (0x2b6), region = 48  ;;  %p314_p7 = scmp.lt.s32.totalorder (!%p266_p6), %s1313_s16, 6 }
   0xc   : > { %s954_s15 = sshll.u32 (!%p266_p6), %s306_s14, 4 }
   0xd   : > { %s1359_s17 = scalar_lea.vmem (!%p266_p6), [#allocation2], %s954_s15  }
  0x10   : > { %v348_v0 = vld [vmem:[%s1408_s2 + $0x20] sm:$0xff]  ;;  %v353_v1 = vld [vmem:[%s1409_s3 + $0x10] sm:$0xff]  ;;  %v347_v2 = vld [vmem:[%s1408_s2 + $0x18] sm:$0xff]  ;;  %s315_s23 = scalar_select %p314_p7, %s1313_s16, 6  ;;  %vm354_vm0 = vcmask 195584   ;;  %vm436_vm1 = vcmask 326656  }
  0x11   : > { %1021 = vmatprep.subr.mxu1 %v348_v0  ;;  %1012 = vmatprep.subr.mxu0 %v353_v1  ;;  %v352_v3 = vld [vmem:[%s1409_s3 + $0x8] sm:$0xff]  ;;  %v346_v4 = vld [vmem:[%s1408_s2 + $0x10] sm:$0xff]  ;;  %v351_v5 = vld [vmem:[%s1409_s3] sm:$0xff]  ;;  %vm531_vm2 = vcmask 261120   ;;  %vm623_vm3 = vcmask 1043456   ;;  %vm616_vm4 = vcmask 31744  }
  0x12   : > { %1022 = vmatpush3.msra.mxu1 %v348_v0  ;;  %1013 = vmatpush3.msra.mxu0 %v353_v1  ;;  %v345_v6 = vld [vmem:[%s1408_s2 + $0x8] sm:$0xff]  ;;  %s956_s30 = sshll.u32 %s315_s23, 3  ;;  %v344_v7 = vld [vmem:[%s1408_s2] sm:$0xff]  ;;  %v530_v12 = vld [vmem:[%s1411_s5 + $0x18] sm:$0xff]  ;;  %s988_s24 = sshll.u32 (%p1299_p4), %s1287_s27, 4 }
  0x13   : > { %1023 = vmatprep.subr.mxu1 %v347_v2  ;;  %1014 = vmatprep.subr.mxu0 %v352_v3  ;;  %s331_s12 = scalar_lea.vmem %s1407_s1, %s956_s30  ;;  %s317_s18 = scalar_lea.vmem %s1406_s0, %s956_s30  ;;  %v529_v13 = vld [vmem:[%s1411_s5 + $0x10] sm:$0xff]  ;;  %v528_v14 = vld [vmem:[%s1411_s5 + $0x8] sm:$0xff]  ;;  %v527_v15 = vld [vmem:[%s1411_s5] sm:$0xff] }
  0x14   : > { %1024 = vmatpush3.msra.mxu1 %v347_v2  ;;  %1015 = vmatpush3.msra.mxu0 %v352_v3  ;;  %v349_v8 = vld [vmem:[%s331_s12] sm:$0xff]  ;;  %v350_v9 = vld [vmem:[%s331_s12 + $0x8] sm:$0xff]  ;;  %s1372_s21 = scalar_lea.vmem (%p1299_p4), %s1413_s7, %s988_s24  }
  0x15   : > { %1025 = vmatprep.subr.mxu1 %v346_v4  ;;  %1016 = vmatprep.subr.mxu0 %v351_v5  ;;  %v342_v10 = vld [vmem:[%s317_s18] sm:$0xff]  ;;  %v343_v11 = vld [vmem:[%s317_s18 + $0x8] sm:$0xff]  ;;  %s726_s18 = ssub.s32 (%p1299_p4), 7, %s1313_s16 }
  0x16   : > { %1026 = vmatpush3.msra.mxu1 %v346_v4  ;;  %1017 = vmatpush3.msra.mxu0 %v351_v5  ;;  %v963_v21 = vld [vmem:[%s1410_s4] ss:$0 sm:$0xff]  ;;  %p727_p8 = scmp.lt.s32.totalorder (%p1299_p4), %s726_s18, 2 }
  0x17   : > { %1027 = vmatprep.subr.mxu1 %v345_v6  ;;  %1018 = vmatprep.mubr.msk.f32.mxu0 %vm354_vm0, %v349_v8  ;;  %v615_v25 = vld [vmem:[%s1412_s6] sm:$0xf] }
  0x18   : > { %1028 = vmatpush3.msra.mxu1 %v345_v6  ;;  %1019 = vmatmul.mubr.msk.f32.vlgmr.msra.gmra.mxu0 %vm354_vm0, %v350_v9 }
  0x19   : > { %1029 = vmatprep.subr.mxu1 %v344_v7  ;;  %1031 = vmatprep.mubr.msk.f32.mxu1 %vm436_vm1, %v342_v10 }
  0x1a   : > { %1030 = vmatpush3.msra.mxu1 %v344_v7  ;;  %1034 = vmatprep.subr.mxu0 %v530_v12 }
  0x1b   : > { %1032 = vmatmul.mubr.msk.f32.vlgmr.msra.gmra.mxu1 %vm436_vm1, %v343_v11  ;;  %1035 = vmatpush3.msra.mxu0 %v530_v12 }
  0x1c   : > { %1036 = vmatprep.subr.mxu0 %v529_v13  ;;  %1045 = vmatprep.subr.msk.mxu1 %vm623_vm3, %v615_v25 }
  0x1d   : > { %1037 = vmatpush3.msra.mxu0 %v529_v13  ;;  %1046 = vmatpush3.msk.msra.mxu1 %vm623_vm3, %v615_v25 }
  0x1e   : > { %1038 = vmatprep.subr.mxu0 %v528_v14 }
  0x1f   : > { %1039 = vmatpush3.msra.mxu0 %v528_v14 }
  0x20   : > { %1040 = vmatprep.subr.mxu0 %v527_v15 }
  0x21   : > { %1041 = vmatpush3.msra.mxu0 %v527_v15 }
  0xd8   : > { %v1020_v16 = vpop.f32.mrf.mxu0 }
  0xda   : > { %v427_v18 = vpop.f32.mrf.mxu0 }
  0xdb   : > { %v1033_v17 = vpop.f32.mrf.mxu1 }
  0xdc   : > { %v515_v19 = vadd.f32 %v1033_v17, %v1020_v16 }
  0xdd   : > { %v509_v20 = vpop.f32.mrf.mxu1 }
  0xde   : > { %v510_v22 = vadd.f32 %v509_v20, %v427_v18  ;;  %v526_v24 = vadd.f32 %v963_v21, %v515_v19 }
  0xe0   : > { %v525_v23 = vadd.f32 %v963_v21, %v510_v22 }
  0xe2   : > { %1042 = vmatprep.mubr.msk.f32.mxu0 %vm531_vm2, %v525_v23 }
  0xe3   : > { %1043 = vmatmul.mubr.msk.f32.vlgmr.msra.gmra.mxu0 %vm531_vm2, %v526_v24 }
 0x1a3   : > { %v1044_v26 = vpop.f32.mrf.mxu0 }
 0x1a4   : > { %v614_v29 = vmax.f32 %v1044_v26, 0.0 }
 0x1a5   : > { %v604_v27 = vpop.f32.mrf.mxu0 }
 0x1a6   : > { %v613_v28 = vmax.f32 %v604_v27, 0.0 }
 0x1a8   : > { %1047 = vmatprep.mubr.msk.f32.mxu1 %vm616_vm4, %v613_v28 }
 0x1a9   : > { %1048 = vmatmul.mubr.msk.f32.vlgmr.msra.gmra.mxu1 %vm616_vm4, %v614_v29 }
 0x269   : > { %v1049_v30 = vpop.f32.mrf.mxu1 }
 0x26a   : > { %v970_v31 = vmul.f32 -1.442695, %v1049_v30 }
 0x26b   : > { %v693_v32 = vpop.f32.mrf.mxu1 }
 0x26c   : > { %1138 = vpow2.f32 %v970_v31  ;;  %v969_v33 = vmul.f32 -1.442695, %v693_v32 }
 0x26e   : > { %1140 = vpow2.f32 %v969_v33 }
 0x279   : > { %v1139_v34 = vpop.eup %1138 }
 0x27a   : > { %v709_v35 = vadd.f32 1.0, %v1139_v34 }
 0x27b   : > { %v1141_v36 = vpop.eup %1140 }
 0x27c   : > { %1142 = vrcp.f32 %v709_v35  ;;  %v708_v37 = vadd.f32 1.0, %v1141_v36 }
 0x27e   : > { %1144 = vrcp.f32 %v708_v37 }
 0x289   : > { %v1143_v38 = vpop.eup %1142 }
 0x28a   : > { %v715_v39 = vmul.f32 %v1143_v38, %v526_v24  ;;  %724 = sbr.rel (!%p1299_p4) target bundleno = 694 (0x2b6), region = 52 }
 0x28b   : > { %v1145_v40 = vpop.eup %1144 }
 0x28c   : > { %717 = vst.msk [vmem:[%s1359_s17 + $0x8] sm:$0xff] %vm531_vm2, %v715_v39  ;;  %v714_v41 = vmul.f32 %v1145_v40, %v525_v23 }
 0x28e   : > { %716 = vst.msk [vmem:[%s1359_s17] sm:$0xff] %vm531_vm2, %v714_v41 }
 0x28f   : > { %s1419_s18 = smov (!%p727_p8, %s726_s18), 2 }
 0x290   : > { %s973_s22 = sshll.u32 %s1419_s18, 7 }
 0x291   : > { %p976_p9 = scmp.eq.s32.totalorder %s973_s22, 0 }
 0x292   : > { %s1378_s23 = sshrl.u32 (!%p976_p9), %s1419_s18, 1 }
 0x293   : > { %735 = sbr.rel (%p976_p9) target bundleno = 694 (0x2b6), region = 56  ;;  %p977_p10 = scmp.le.s32.totalorder (!%p976_p9), %s1378_s23, 0 }
 0x298   : > { %900 = sbr.rel (%p977_p10) target bundleno = 677 (0x2a5), region = 135  ;;  %s1202_s27 = smov (!%p977_p10), %s1372_s21  }
 0x299   : > { %s1206_s9 = smov (!%p977_p10), %s1359_s17   ;;  %s1210_s16 = smov (!%p977_p10), 0  }
 0x29a   : > { %s1214_s26 = smov (!%p977_p10), 0  }
 0x29d LB: >> { %v800_v42 = vld [vmem:[%s1208_s9] sm:$0xff]  ;;  %v802_v43 = vld [vmem:[%s1208_s9 + $0x8] sm:$0xff]  ;;  %s804_s29 = sadd.s32 1, %s1212_s16  ;;  %s794_s26 = sadd.s32 1, %s1216_s26   ;;  %s1216_s26 = sphi %s1214_s26, %s794_s26   ;;  %s1212_s16 = sphi %s1210_s16, %s1211_s16   ;;  %s1208_s9 = sphi %s1206_s9, %s809_s9   ;;  %s1204_s27 = sphi %s1202_s27, %s810_s27  }
 0x29e   : >> { %801 = vst [vmem:[%s1204_s27] sm:$0xff] %v800_v42  ;;  %803 = vst [vmem:[%s1204_s27 + $0x8] sm:$0xff] %v802_v43  ;;  %p805_p11 = scmp.ge.s32.totalorder %s804_s29, %s1378_s23  ;;  %p793_p12 = scmp.ge.s32.totalorder %s794_s26, %s1378_s23 }
 0x2a0   : >> { %s1421_s29 = smov (%p805_p11, %s804_s29), 0  ;;  %796 = sbr.rel (!%p793_p12) target bundleno = 669 (0x29d), region = 141 }
 0x2a1   : >> { %s978_s30 = sshll.u32 %s1421_s29, 4  ;;  %s1211_s16 = smov %s1421_s29  }
 0x2a2   : >> { %s809_s9 = scalar_lea.vmem %s1359_s17, %s978_s30 [#allocation2]   ;;  %s810_s27 = scalar_lea.vmem %s1372_s21, %s978_s30  }
 0x2a5 PF: > { %s1388_s10 = sand.u32 1, %s1419_s18   ;;  %s989_s11 = sshll.u32 %s1378_s23, 4 }
 0x2a6   : > { %s815_s12 = scalar_lea.vmem %s1359_s17, %s989_s11 [#allocation2]   ;;  %s817_s13 = scalar_lea.vmem %s1372_s21, %s989_s11  }
 0x2a7   : > { %p983_p13 = scmp.le.s32.totalorder %s1388_s10, 0 }
 0x2a8   : > { %s1218_s14 = smov (!%p983_p13), %s817_s13   ;;  %s1222_s15 = smov (!%p983_p13), %s815_s12  }
 0x2a9   : > { %914 = sbr.rel (%p983_p13) target bundleno = 694 (0x2b6), region = 146  ;;  %s1226_s24 = smov (!%p983_p13), 0  }
 0x2aa   : > { %s1230_s19 = smov (!%p983_p13), 0  }
 0x2ae LB: >> { %v827_v44 = vld [vmem:[%s1224_s15] sm:$0xff]  ;;  %s829_s18 = sadd.s32 1, %s1228_s24  ;;  %s821_s19 = sadd.s32 1, %s1232_s19   ;;  %s1232_s19 = sphi %s1230_s19, %s821_s19   ;;  %s1228_s24 = sphi %s1226_s24, %s1227_s24   ;;  %s1224_s15 = sphi %s1222_s15, %s834_s15   ;;  %s1220_s14 = sphi %s1218_s14, %s835_s14  }
 0x2af   : >> { %828 = vst [vmem:[%s1220_s14] sm:$0xff] %v827_v44  ;;  %p830_p0 = scmp.ge.s32.totalorder %s829_s18, %s1388_s10  ;;  %p820_p1 = scmp.ge.s32.totalorder %s821_s19, %s1388_s10 }
 0x2b1   : >> { %s1423_s18 = smov (%p830_p0, %s829_s18), 0  ;;  %823 = sbr.rel (!%p820_p1) target bundleno = 686 (0x2ae), region = 152 }
 0x2b2   : >> { %s984_s17 = sshll.u32 %s1423_s18, 3  ;;  %s1227_s24 = smov %s1423_s18  }
 0x2b3   : >> { %s834_s15 = scalar_lea.vmem %s815_s12, %s984_s17 [#allocation2]   ;;  %s835_s14 = scalar_lea.vmem %s817_s13, %s984_s17  }
 0x2b6 PF: > { %p14_p2 = scmp.ge.s32.totalorder %s1289_s28, 6   ;;  %s1415_s24 = smov %s1196_s25 }
 0x2b7   : > { %s1416_s25 = smov %s1297_s8  ;;  %s1417_s26 = smov %s1289_s28 }
 0x2b8   :  { %16 = sbr.rel (!%p14_p2) target bundleno = 2 (0x2), region = 163 }

</bundles_post_ra>
